<compile_context>
chip_gen: v5e
topology: v5e:2x2
jax: 0.10.0
libtpu: 0.0.40
codegen_flags: <defaults>
</compile_context>

<pallas_src>
import jax
import jax.numpy as jnp
from jax.experimental import pallas as pl
from jax.experimental.pallas import tpu as pltpu

_LANE = 128


def _gather_kernel(labels_ref, table_ref, out_ref):
    # labels_ref: VMEM (TB, 1)  int32 — effective labels for this batch tile.
    # table_ref:  VMEM (V, Hp)        — full embedding table, resident (Buffered(1)).
    # out_ref:    VMEM (TB, Hp)       — lane/sublane-dense output slab.
    tb = out_ref.shape[0]
    v = table_ref.shape[0]

    lbl = labels_ref[...]                                     # (TB, 1) int32
    cols = jax.lax.broadcasted_iota(jnp.int32, (tb, v), 1)    # (TB, V)
    one_hot = (cols == lbl).astype(table_ref.dtype)           # (TB, V)

    # One-hot gather on the MXU. HIGHEST precision => exact f32 row selection.
    out_ref[...] = jnp.dot(
        one_hot,
        table_ref[...],
        precision=jax.lax.Precision.HIGHEST,
        preferred_element_type=jnp.float32,
    ).astype(out_ref.dtype)


def _vmem_capacity_bytes():
    """Generation-aware VMEM capacity (64 MiB/TC on v7x, 128 MiB on v5e/v6e)."""
    try:
        cap = getattr(pltpu.get_tpu_info(), "vmem_capacity_bytes", None)
        if cap:
            return int(cap)
    except Exception:
        pass
    return 64 << 20  # conservative default (v7x per-TensorCore VMEM)


def _embedding_gather(effective_labels, table, *, block_b=128):
    """out[b, :] = table[effective_labels[b], :] via a table-resident MXU gather."""
    B = effective_labels.shape[0]
    V, H = table.shape
    itemsize = jnp.dtype(table.dtype).itemsize

    # Lane-dense output: pad H to a multiple of 128 (no-op for real DiT widths).
    Hp = _LANE * pl.cdiv(H, _LANE)
    # Sublane-dense batch tiles: pad B to a multiple of the batch tile.
    pb = block_b * pl.cdiv(B, block_b)

    # VMEM budget: single-buffered resident table + double-buffered out/label tiles.
    table_bytes = V * Hp * itemsize
    out_bytes = 2 * block_b * Hp * itemsize
    lbl_bytes = 2 * block_b * 4
    needed = table_bytes + out_bytes + lbl_bytes + (2 << 20)
    capacity = _vmem_capacity_bytes()

    if needed > int(0.85 * capacity):
        # TODO(synk): implement an H-chunked Pallas pipeline (table spec (V, TH),
        # H axis outer) for tables that exceed VMEM; use XLA's gather meanwhile.
        return jnp.take(table, effective_labels.astype(jnp.int32), axis=0)

    labels2d = effective_labels.astype(jnp.int32).reshape(B, 1)
    if pb != B:
        labels2d = jnp.pad(labels2d, ((0, pb - B), (0, 0)))
    if Hp != H:
        table = jnp.pad(table, ((0, 0), (0, Hp - H)))

    vmem_limit = int(min(max(needed, 32 << 20), capacity))

    out = pl.pallas_call(
        _gather_kernel,
        out_shape=jax.ShapeDtypeStruct((pb, Hp), table.dtype),
        grid=(pb // block_b,),
        in_specs=[
            # Labels tile for this grid step.
            pl.BlockSpec((block_b, 1), lambda i: (i, 0)),
            # Full-extent table, constant block index, single-buffered:
            # DMA'd from HBM once and VMEM-resident for the whole grid.
            pl.BlockSpec((V, Hp), lambda i: (0, 0), pipeline_mode=pl.Buffered(1)),
        ],
        out_specs=pl.BlockSpec((block_b, Hp), lambda i: (i, 0)),
        compiler_params=pltpu.CompilerParams(
            # "arbitrary": keep the grid on one core so v7x's two TensorCores
            # don't each pull a private copy of the table (table DMA dominates).
            dimension_semantics=("arbitrary",),
            vmem_limit_bytes=vmem_limit,
        ),
    )(labels2d, table)

    return out[:B, :H]


class LabelEmbedderPallas:
    """JAX/Pallas port of SDiT's LabelEmbedder (embedding lookup + CFG label drop)."""

    def __init__(self, num_classes, hidden_size, dropout_prob, key):
        use_cfg_embedding = int(dropout_prob > 0)
        self.num_classes = num_classes
        self.hidden_size = hidden_size
        self.dropout_prob = dropout_prob
        # nn.Embedding default init: N(0, 1); deterministic via PRNGKey.
        self.embedding_table = jax.random.normal(
            key, (num_classes + use_cfg_embedding, hidden_size), jnp.float32)

    def _effective_labels(self, labels, train, force_drop_ids, rng):
        labels = labels.astype(jnp.int32)
        use_dropout = self.dropout_prob > 0
        if (train and use_dropout) or (force_drop_ids is not None):
            if (force_drop_ids is not None) and not use_dropout:
                raise ValueError(
                    "force_drop_ids requires dropout_prob > 0 (no CFG embedding row).")
            if force_drop_ids is None:
                if rng is None:
                    raise ValueError(
                        "rng is required when train=True and dropout_prob > 0.")
                drop = jax.random.uniform(rng, (labels.shape[0],)) < self.dropout_prob
            else:
                drop = force_drop_ids == 1
            labels = jnp.where(drop, self.num_classes, labels)
        return labels

    def __call__(self, labels, train, force_drop_ids=None, rng=None):
        eff = self._effective_labels(labels, train, force_drop_ids, rng)
        return _embedding_gather(eff, self.embedding_table)


if __name__ == "__main__":
    num_classes = 10
    hidden_size = 32
    dropout_prob = 0.1
    batch = 8

    root = jax.random.PRNGKey(0)
    k_tab, k_lbl, k_drop, k_big = jax.random.split(root, 4)

    embedder = LabelEmbedderPallas(num_classes, hidden_size, dropout_prob, k_tab)
    labels = jax.random.randint(k_lbl, (batch,), 0, num_classes, dtype=jnp.int32)
    table = embedder.embedding_table

    # 1) eval path (no dropout)
    out_eval = jax.block_until_ready(embedder(labels, train=False))
    ref_eval = table[labels]
    assert out_eval.shape == (batch, hidden_size)
    assert jnp.allclose(out_eval, ref_eval, atol=1e-5, rtol=1e-5)

    # 2) train path with label dropout (classifier-free guidance)
    out_train = jax.block_until_ready(embedder(labels, train=True, rng=k_drop))
    drop = jax.random.uniform(k_drop, (batch,)) < dropout_prob
    ref_train = table[jnp.where(drop, num_classes, labels)]
    assert jnp.allclose(out_train, ref_train, atol=1e-5, rtol=1e-5)

    # 3) forced drops
    force = jnp.array([1, 0, 1, 0, 0, 0, 0, 1], dtype=jnp.int32)
    out_force = jax.block_until_ready(
        embedder(labels, train=False, force_drop_ids=force))
    ref_force = table[jnp.where(force == 1, num_classes, labels)]
    assert jnp.allclose(out_force, ref_force, atol=1e-5, rtol=1e-5)

    # 4) batch not a multiple of the batch tile (exercises the padding path)
    labels5 = labels[:5]
    out5 = jax.block_until_ready(embedder(labels5, train=False))
    assert out5.shape == (5, hidden_size)
    assert jnp.allclose(out5, table[labels5], atol=1e-5, rtol=1e-5)

    # 5) multi-tile grid (B > block_b) with padding
    labels_big = jax.random.randint(k_big, (200,), 0, num_classes, dtype=jnp.int32)
    out_big = jax.block_until_ready(embedder(labels_big, train=False))
    assert out_big.shape == (200, hidden_size)
    assert jnp.allclose(out_big, table[labels_big], atol=1e-5, rtol=1e-5)

    print("KERNEL_OK")
</pallas_src>

<mosaic_0001>
module attributes {stable_mosaic.version = 11 : i64} {
  func.func @_gather_kernel(%arg0: i32, %arg1: memref<128x1xi32, #tpu.memory_space<vmem>>, %arg2: memref<11x128xf32, #tpu.memory_space<vmem>>, %arg3: memref<128x128xf32, #tpu.memory_space<vmem>>) attributes {dimension_semantics = [#tpu.dimension_semantics<arbitrary>], iteration_bounds = array<i64: 1>, scalar_prefetch = 0 : i64, scratch_operands = 0 : i64, tpu.core_type = #tpu.core_type<tc>, window_params = [{transform_indices = @transform_0, window_bounds = array<i64: 128, 1>}, {pipeline_mode = #tpu.pipeline_mode<synchronous>, transform_indices = @transform_1, window_bounds = array<i64: 11, 128>}, {transform_indices = @transform_2, window_bounds = array<i64: 128, 128>}]} {
    %c0 = arith.constant 0 : index
    %c0_0 = arith.constant 0 : index
    %0 = vector.load %arg1[%c0, %c0_0] : memref<128x1xi32, #tpu.memory_space<vmem>>, vector<128x1xi32>
    %1 = tpu.iota {dimensions = array<i32: 1>} : vector<128x11xi32>
    %2 = vector.broadcast %0 : vector<128x1xi32> to vector<128x11xi32>
    %3 = arith.cmpi eq, %1, %2 : vector<128x11xi32>
    %4 = arith.extui %3 : vector<128x11xi1> to vector<128x11xi32>
    %5 = arith.sitofp %4 : vector<128x11xi32> to vector<128x11xf32>
    %c0_1 = arith.constant 0 : index
    %c0_2 = arith.constant 0 : index
    %6 = vector.load %arg2[%c0_1, %c0_2] : memref<11x128xf32, #tpu.memory_space<vmem>>, vector<11x128xf32>
    %cst = arith.constant dense<0.000000e+00> : vector<128x128xf32>
    %7 = tpu.matmul %5, %6, %cst {dimension_numbers = #tpu.dot_dimension_numbers<[1], [0], [0], [1], [0, 0, 1, 1], [], []>, precision = #tpu.contract_precision<fp32>} : vector<128x11xf32>, vector<11x128xf32>, vector<128x128xf32> -> vector<128x128xf32>
    %c0_3 = arith.constant 0 : index
    %c0_4 = arith.constant 0 : index
    %8 = vector.load %arg3[%c0_3, %c0_4] : memref<128x128xf32, #tpu.memory_space<vmem>>, vector<128x128xf32>
    tpu.vector_store %arg3[%c0_3, %c0_4], %7 {strides = array<i32>} : memref<128x128xf32, #tpu.memory_space<vmem>>, vector<128x128xf32>,
    return
  }
  func.func @transform_0(%arg0: i32) -> (i32, i32) {
    %c0_i32 = arith.constant 0 : i32
    %c0_i32_0 = arith.constant 0 : i32
    return %arg0, %c0_i32 : i32, i32
  }
  func.func @transform_1(%arg0: i32) -> (i32, i32) {
    %c0_i32 = arith.constant 0 : i32
    %c0_i32_0 = arith.constant 0 : i32
    %c0_i32_1 = arith.constant 0 : i32
    return %c0_i32, %c0_i32_0 : i32, i32
  }
  func.func @transform_2(%arg0: i32) -> (i32, i32) {
    %c0_i32 = arith.constant 0 : i32
    %c0_i32_0 = arith.constant 0 : i32
    return %arg0, %c0_i32 : i32, i32
  }
}

</mosaic_0001>

<bundles_post_ra>
// kernel: tpu_custom_call.1
= control target key start
LH: loop header
LB: loop body
LE: loop exit
PB: predicated region body
PF: predicated region fallthrough
CT: control target
= control target key end

     0   :  { %v941_v2 = vmov 0   ;;  %s1406_s0 = inlined_call_operand.vmem [shape: s32[128,1], index: 0, kind: input, shape index: {}]   ;;  %s1407_s1 = inlined_call_operand.vmem [shape: f32[11,128], index: 1, kind: input, shape index: {}]   ;;  %s1408_s2 = inlined_call_operand.hbm [shape: f32[128,128], index: 2, kind: output, shape index: {}]  }
   0x1   :  { %v20_v0 = vld [vmem:[%s1406_s0 + $0x40] sm:$0xff]  ;;  %913 = vset.pattern.permute.xlu1 %v941_v2  ;;  %912 = vset.pattern.permute.xlu0 %v941_v2  ;;  %v13_v3 = vld [vmem:[%s1406_s0 + $0x8] sm:$0xff] }
   0x2   :  { %v12_v1 = vld [vmem:[%s1406_s0] sm:$0xff]  ;;  %55 = vperm.xlu0 %912, %v20_v0   ;;  %914 = vset.pattern.permute.xlu2 %v941_v2 }
   0x3   :  { %31 = vperm.xlu1 %913, %v12_v1   ;;  %34 = vperm.xlu2 %914, %v13_v3  }
   0x4   :  { %7 = vsyncpa [#allocation3], 0  ;;  %v21_v4 = vld [vmem:[%s1406_s0 + $0x48] sm:$0xff]  ;;  %v22_v5 = vld [vmem:[%s1406_s0 + $0x50] sm:$0xff]  ;;  %vm177_vm0 = vcmask 1042432   ;;  %v28_v30 = vlaneseq  ;;  %v942_v33 = vmov 0.0  }
   0x5   :  { %v23_v6 = vld [vmem:[%s1406_s0 + $0x58] sm:$0xff]  ;;  %v14_v7 = vld [vmem:[%s1406_s0 + $0x10] sm:$0xff]  ;;  %v24_v8 = vld [vmem:[%s1406_s0 + $0x60] sm:$0xff]  ;;  %vm128_vm2 = vcmask 89088   ;;  %s827_s19 = sshll.u32 %s1408_s2, 4  ;;  %s944_s20 = smov 128   ;;  %s828_s19 = int_to_ptr.hbm [resolvable:$true] %s827_s19 }
   0x6   :  { %v15_v9 = vld [vmem:[%s1406_s0 + $0x18] sm:$0xff]  ;;  %v25_v10 = vld [vmem:[%s1406_s0 + $0x68] sm:$0xff]  ;;  %v16_v11 = vld [vmem:[%s1406_s0 + $0x20] sm:$0xff]  ;;  %v1015_v32 = vand.u32 127, %v28_v30  ;;  %s945_s21 = smov 8  }
   0x7   :  { %v26_v12 = vld [vmem:[%s1406_s0 + $0x70] sm:$0xff]  ;;  %v17_v13 = vld [vmem:[%s1406_s0 + $0x28] sm:$0xff]  ;;  %v27_v14 = vld [vmem:[%s1406_s0 + $0x78] sm:$0xff] }
   0x8   :  { %v18_v15 = vld [vmem:[%s1406_s0 + $0x30] sm:$0xff]  ;;  %v19_v16 = vld [vmem:[%s1406_s0 + $0x38] sm:$0xff]  ;;  %v127_v17 = vld [vmem:[%s1407_s1 + $0x8] sm:$0x7]  ;;  %s943_s0 = smov [#allocation2]  }
   0x9   :  { %v179_v18 = vsel %vm177_vm0, %v127_v17, 0  ;;  %v126_v20 = vld [vmem:[%s1407_s1] sm:$0xff]  ;;  %s825_s1 = sshll.u32 %s943_s0, 4  ;;  %s826_s1 = int_to_ptr.vmem [resolvable:$true] %s825_s1 }
   0xa   :  { %58 = vperm.xlu0 %912, %v21_v4   ;;  %v195_v19 = vand.u32 4294901760, %v179_v18  ;;  %v197_v22 = vand.u32 4294901760, %v126_v20 }
   0xb   :  { %61 = vperm.xlu1 %913, %v22_v5   ;;  %64 = vperm.xlu2 %914, %v23_v6  }
   0xc   :  { %v343_v21 = vsub.f32 %v179_v18, %v195_v19  ;;  %196 = vmatpush.msra.mxu0 %v195_v19  ;;  %903 = vmatpush.msra.mxu2 %v195_v19  ;;  %v349_v24 = vsub.f32 %v126_v20, %v197_v22 }
   0xe   :  { %v344_v23 = vand.u32 4294901760, %v343_v21  ;;  %198 = vmatpush.msra.mxu0 %v197_v22  ;;  %904 = vmatpush.msra.mxu2 %v197_v22  ;;  %v350_v26 = vand.u32 4294901760, %v349_v24 }
  0x10   :  { %435 = vmatpush.msrb.mxu2 %v343_v21  ;;  %v345_v25 = vsub.f32 %v343_v21, %v344_v23  ;;  %652 = vmatpush.msrb.mxu0 %v344_v23  ;;  %v351_v28 = vsub.f32 %v349_v24, %v350_v26 }
  0x12   :  { %37 = vperm.xlu0 %912, %v14_v7   ;;  %438 = vmatpush.msrb.mxu2 %v349_v24  ;;  %v346_v27 = vand.u32 4294901760, %v345_v25  ;;  %v352_v29 = vand.u32 4294901760, %v351_v28 }
  0x13   :  { %67 = vperm.xlu1 %913, %v24_v8   ;;  %40 = vperm.xlu2 %914, %v15_v9  }
  0x14   :  { %656 = vmatpush.msrb.mxu0 %v350_v26  ;;  %347 = vmatpush.msra.mxu1 %v346_v27 }
  0x15   :  { %905 = vmatpush.msra.mxu3 %v346_v27 }
  0x16   :  { %353 = vmatpush.msra.mxu1 %v352_v29 }
  0x17   :  { %906 = vmatpush.msra.mxu3 %v352_v29 }
  0x18   :  { %737 = vmatpush.msrb.mxu1 %v195_v19 }
  0x19   :  { %535 = vmatpush.msrb.mxu3 %v195_v19 }
  0x1a   :  { %70 = vperm.xlu0 %912, %v25_v10   ;;  %739 = vmatpush.msrb.mxu1 %v197_v22 }
  0x1b   :  { %43 = vperm.xlu1 %913, %v16_v11   ;;  %73 = vperm.xlu2 %914, %v26_v12  }
  0x1c   :  { %537 = vmatpush.msrb.mxu3 %v197_v22 }
  0x22   :  { %46 = vperm.xlu0 %912, %v17_v13  }
  0x23   :  { %76 = vperm.xlu1 %913, %v27_v14   ;;  %49 = vperm.xlu2 %914, %v18_v15  }
  0x2a   :  { %52 = vperm.xlu0 %912, %v19_v16  }
  0x5d   :  { %v35_v31 = vpop.permute.xlu2 %34 }
  0x5e   :  { %vm79_vm1 = vcmp.eq.s32.totalorder %v1015_v32, %v35_v31 }
  0x5f   :  { %v1019_v34 = vsel %vm79_vm1, 1.0, %v942_v33 }
  0x60   :  { %v133_v37 = vsel %vm128_vm2, %v1019_v34, 0 }
  0x61   :  { %v1039_v43 = vsub.f32 %v133_v37, %v133_v37 }
  0x63   :  { %v209_v52 = vand.u32 4294901760, %v1039_v43 }
  0x65   :  { %v65_v38 = vpop.permute.xlu2 %64  ;;  %v210_v61 = vsub.f32 %v1039_v43, %v209_v52 }
  0x66   :  { %vm89_vm7 = vcmp.eq.s32.totalorder %v1015_v32, %v65_v38 }
  0x67   :  { %v1081_v0 = vsel %vm89_vm7, 1.0, %v942_v33  ;;  %v211_v4 = vand.u32 4294901760, %v210_v61 }
  0x68   :  { %v163_v6 = vsel %vm128_vm2, %v1081_v0, 0 }
  0x69   :  { %v1106_v13 = vsub.f32 %v163_v6, %v163_v6 }
  0x6b   :  { %v289_v22 = vand.u32 4294901760, %v1106_v13 }
  0x6d   :  { %v41_v59 = vpop.permute.xlu2 %40  ;;  %v290_v29 = vsub.f32 %v1106_v13, %v289_v22 }
  0x6e   :  { %vm81_vm8 = vcmp.eq.s32.totalorder %v1015_v32, %v41_v59 }
  0x6f   :  { %v1084_v1 = vsel %vm81_vm8, 1.0, %v942_v33  ;;  %v291_v38 = vand.u32 4294901760, %v290_v29 }
  0x70   :  { %v139_v10 = vsel %vm128_vm2, %v1084_v1, 0 }
  0x71   :  { %v1109_v14 = vsub.f32 %v139_v10, %v139_v10 }
  0x73   :  { %v225_v26 = vand.u32 4294901760, %v1109_v14 }
  0x74   :  { %v56_v35 = vpop.permute.xlu0 %55 }
  0x75   :  { %v32_v36 = vpop.permute.xlu1 %31  ;;  %vm86_vm3 = vcmp.eq.s32.totalorder %v1015_v32, %v56_v35  ;;  %v74_v17 = vpop.permute.xlu2 %73  ;;  %v226_v35 = vsub.f32 %v1109_v14, %v225_v26 }
  0x76   :  { %vm78_vm4 = vcmp.eq.s32.totalorder %v1015_v32, %v32_v36  ;;  %v1026_v39 = vsel %vm86_vm3, 1.0, %v942_v33  ;;  %vm92_vm14 = vcmp.eq.s32.totalorder %v1015_v32, %v74_v17 }
  0x77   :  { %v1029_v40 = vsel %vm78_vm4, 1.0, %v942_v33  ;;  %v154_v41 = vsel %vm128_vm2, %v1026_v39, 0  ;;  %863 = vmatmul.msk.f32.vlgmr.msra.gmra.mxu3 %vm128_vm2, %v1026_v39  ;;  %v1176_v61 = vsel %vm92_vm14, 1.0, %v942_v33 }
  0x78   :  { %v130_v42 = vsel %vm128_vm2, %v1029_v40, 0  ;;  %855 = vmatmul.msk.f32.vlgmr.msra.gmra.mxu1 %vm128_vm2, %v1029_v40  ;;  %v1041_v44 = vsub.f32 %v154_v41, %v154_v41 }
  0x79   :  { %v1043_v45 = vsub.f32 %v130_v42, %v130_v42 }
  0x7a   :  { %v265_v47 = vand.u32 4294901760, %v1041_v44 }
  0x7b   :  { %v201_v46 = vand.u32 4294901760, %v1043_v45 }
  0x7c   :  { %v59_v48 = vpop.permute.xlu0 %58  ;;  %v266_v51 = vsub.f32 %v1041_v44, %v265_v47 }
  0x7d   :  { %v62_v49 = vpop.permute.xlu1 %61  ;;  %v202_v50 = vsub.f32 %v1043_v45, %v201_v46  ;;  %vm87_vm5 = vcmp.eq.s32.totalorder %v1015_v32, %v59_v48  ;;  %v50_v41 = vpop.permute.xlu2 %49  ;;  %v227_v48 = vand.u32 4294901760, %v226_v35 }
  0x7e   :  { %vm88_vm6 = vcmp.eq.s32.totalorder %v1015_v32, %v62_v49  ;;  %v1057_v53 = vsel %vm87_vm5, 1.0, %v942_v33  ;;  %v267_v56 = vand.u32 4294901760, %v266_v51  ;;  %vm84_vm15 = vcmp.eq.s32.totalorder %v1015_v32, %v50_v41 }
  0x7f   :  { %v1060_v54 = vsel %vm88_vm6, 1.0, %v942_v33  ;;  %v203_v55 = vand.u32 4294901760, %v202_v50  ;;  %v157_v57 = vsel %vm128_vm2, %v1057_v53, 0  ;;  %864 = vmatmul.msk.f32.gmra.mxu3 %vm128_vm2, %v1057_v53 }
  0x80   :  { %v160_v58 = vsel %vm128_vm2, %v1060_v54, 0  ;;  %856 = vmatmul.msk.f32.gmra.mxu1 %vm128_vm2, %v1019_v34  ;;  %v1071_v60 = vsub.f32 %v157_v57, %v157_v57  ;;  %268 = vmatmul.f32.vlgmr.msra.gmra.mxu2 %v267_v56 }
  0x81   :  { %204 = vmatmul.f32.vlgmr.msra.gmra.mxu0 %v203_v55  ;;  %v1077_v62 = vsub.f32 %v160_v58, %v160_v58 }
  0x82   :  { %v273_v63 = vand.u32 4294901760, %v1071_v60 }
  0x83   :  { %v281_v9 = vand.u32 4294901760, %v1077_v62 }
  0x84   :  { %v38_v2 = vpop.permute.xlu0 %37  ;;  %v274_v5 = vsub.f32 %v1071_v60, %v273_v63 }
  0x85   :  { %v68_v3 = vpop.permute.xlu1 %67  ;;  %vm80_vm9 = vcmp.eq.s32.totalorder %v1015_v32, %v38_v2  ;;  %v282_v16 = vsub.f32 %v1077_v62, %v281_v9  ;;  %v1179_v2 = vsel %vm84_vm15, 1.0, %v942_v33 }
  0x86   :  { %v1093_v7 = vsel %vm80_vm9, 1.0, %v942_v33  ;;  %v275_v8 = vand.u32 4294901760, %v274_v5  ;;  %vm90_vm10 = vcmp.eq.s32.totalorder %v1015_v32, %v68_v3 }
  0x87   :  { %v136_v11 = vsel %vm128_vm2, %v1093_v7, 0  ;;  %865 = vmatmul.msk.f32.gmra.mxu3 %vm128_vm2, %v1060_v54  ;;  %v1116_v18 = vsel %vm90_vm10, 1.0, %v942_v33  ;;  %v283_v25 = vand.u32 4294901760, %v282_v16  ;;  %v148_v16 = vsel %vm128_vm2, %v1179_v2, 0 }
  0x88   :  { %857 = vmatmul.msk.f32.gmra.mxu1 %vm128_vm2, %v1093_v7  ;;  %v1104_v12 = vsub.f32 %v136_v11, %v136_v11  ;;  %276 = vmatmul.f32.gmra.mxu2 %v275_v8  ;;  %v166_v27 = vsel %vm128_vm2, %v1116_v18, 0  ;;  %v172_v11 = vsel %vm128_vm2, %v1176_v61, 0 }
  0x89   :  { %212 = vmatmul.f32.gmra.mxu0 %v211_v4  ;;  %v1139_v30 = vsub.f32 %v166_v27, %v166_v27  ;;  %v1193_v17 = vsub.f32 %v172_v11, %v172_v11 }
  0x8a   :  { %v217_v15 = vand.u32 4294901760, %v1104_v12 }
  0x8b   :  { %v297_v50 = vand.u32 4294901760, %v1139_v30 }
  0x8c   :  { %v71_v19 = vpop.permute.xlu0 %70  ;;  %v218_v21 = vsub.f32 %v1104_v12, %v217_v15 }
  0x8d   :  { %v44_v20 = vpop.permute.xlu1 %43  ;;  %vm91_vm12 = vcmp.eq.s32.totalorder %v1015_v32, %v71_v19  ;;  %v298_v59 = vsub.f32 %v1139_v30, %v297_v50  ;;  %v248_v19 = vsub.f32 %v148_v16, %v148_v16 }
  0x8e   :  { %vm82_vm11 = vcmp.eq.s32.totalorder %v1015_v32, %v44_v20  ;;  %v219_v24 = vand.u32 4294901760, %v218_v21  ;;  %v1147_v36 = vsel %vm91_vm12, 1.0, %v942_v33 }
  0x8f   :  { %v1124_v23 = vsel %vm82_vm11, 1.0, %v942_v33  ;;  %866 = vmatmul.msk.f32.gmra.mxu3 %vm128_vm2, %v1081_v0  ;;  %v169_v51 = vsel %vm128_vm2, %v1147_v36, 0  ;;  %v299_v6 = vand.u32 4294901760, %v298_v59  ;;  %v249_v29 = vand.u32 4294901760, %v248_v19 }
  0x90   :  { %v142_v28 = vsel %vm128_vm2, %v1124_v23, 0  ;;  %858 = vmatmul.msk.f32.gmra.mxu1 %vm128_vm2, %v1084_v1  ;;  %284 = vmatmul.f32.gmra.mxu2 %v283_v25  ;;  %v1165_v56 = vsub.f32 %v169_v51, %v169_v51 }
  0x91   :  { %220 = vmatmul.f32.gmra.mxu0 %v219_v24  ;;  %v1141_v31 = vsub.f32 %v142_v28, %v142_v28  ;;  %v250_v41 = vsub.f32 %v248_v19, %v249_v29 }
  0x92   :  { %v305_v10 = vand.u32 4294901760, %v1165_v56 }
  0x93   :  { %v233_v49 = vand.u32 4294901760, %v1141_v31  ;;  %v251_v51 = vand.u32 4294901760, %v250_v41 }
  0x94   :  { %v47_v37 = vpop.permute.xlu0 %46  ;;  %v306_v21 = vsub.f32 %v1165_v56, %v305_v10 }
  0x95   :  { %vm83_vm13 = vcmp.eq.s32.totalorder %v1015_v32, %v47_v37  ;;  %v234_v58 = vsub.f32 %v1141_v31, %v233_v49  ;;  %v77_v3 = vpop.permute.xlu1 %76 }
  0x96   :  { %v1151_v42 = vsel %vm83_vm13, 1.0, %v942_v33  ;;  %vm93_vm0 = vcmp.eq.s32.totalorder %v1015_v32, %v77_v3  ;;  %v307_v28 = vand.u32 4294901760, %v306_v21 }
  0x97   :  { %v145_v55 = vsel %vm128_vm2, %v1151_v42, 0  ;;  %867 = vmatmul.msk.f32.gmra.mxu3 %vm128_vm2, %v1116_v18  ;;  %v235_v5 = vand.u32 4294901760, %v234_v58  ;;  %v1200_v24 = vsel %vm93_vm0, 1.0, %v942_v33 }
  0x98   :  { %859 = vmatmul.msk.f32.gmra.mxu1 %vm128_vm2, %v1124_v23  ;;  %292 = vmatmul.f32.gmra.mxu2 %v291_v38  ;;  %v1167_v57 = vsub.f32 %v145_v55, %v145_v55  ;;  %v175_v35 = vsel %vm128_vm2, %v1200_v24, 0 }
  0x99   :  { %228 = vmatmul.f32.gmra.mxu0 %v227_v48 }
  0x9a   :  { %v241_v8 = vand.u32 4294901760, %v1167_v57 }
  0x9c   :  { %v53_v4 = vpop.permute.xlu0 %52  ;;  %v242_v20 = vsub.f32 %v1167_v57, %v241_v8 }
  0x9d   :  { %vm85_vm1 = vcmp.eq.s32.totalorder %v1015_v32, %v53_v4  ;;  %v313_v32 = vand.u32 4294901760, %v1193_v17 }
  0x9e   :  { %v1203_v25 = vsel %vm85_vm1, 1.0, %v942_v33  ;;  %v243_v27 = vand.u32 4294901760, %v242_v20  ;;  %v1214_v33 = vsub.f32 %v175_v35, %v175_v35 }
  0x9f   :  { %868 = vmatmul.msk.f32.gmra.mxu3 %vm128_vm2, %v1147_v36  ;;  %v151_v37 = vsel %vm128_vm2, %v1203_v25, 0  ;;  %v314_v48 = vsub.f32 %v1193_v17, %v313_v32 }
  0xa0   :  { %860 = vmatmul.msk.f32.gmra.mxu1 %vm128_vm2, %v1151_v42  ;;  %300 = vmatmul.f32.gmra.mxu2 %v299_v6  ;;  %v256_v38 = vsub.f32 %v151_v37, %v151_v37  ;;  %v321_v59 = vand.u32 4294901760, %v1214_v33 }
  0xa1   :  { %236 = vmatmul.f32.gmra.mxu0 %v235_v5  ;;  %v315_v55 = vand.u32 4294901760, %v314_v48 }
  0xa2   :  { %v257_v58 = vand.u32 4294901760, %v256_v38  ;;  %v322_v4 = vsub.f32 %v1214_v33, %v321_v59 }
  0xa4   :  { %v258_v3 = vsub.f32 %v256_v38, %v257_v58  ;;  %v323_v6 = vand.u32 4294901760, %v322_v4 }
  0xa6   :  { %v259_v5 = vand.u32 4294901760, %v258_v3 }
  0xa7   :  { %869 = vmatmul.msk.f32.gmra.mxu3 %vm128_vm2, %v1176_v61 }
  0xa8   :  { %861 = vmatmul.msk.f32.gmra.mxu1 %vm128_vm2, %v1179_v2  ;;  %308 = vmatmul.f32.gmra.mxu2 %v307_v28 }
  0xa9   :  { %244 = vmatmul.f32.gmra.mxu0 %v243_v27 }
  0xaf   :  { %870 = vmatmul.msk.f32.gmra.mxu3 %vm128_vm2, %v1200_v24 }
  0xb0   :  { %862 = vmatmul.msk.f32.gmra.mxu1 %vm128_vm2, %v1203_v25  ;;  %316 = vmatmul.f32.gmra.mxu2 %v315_v55 }
  0xb1   :  { %252 = vmatmul.f32.gmra.mxu0 %v251_v51 }
  0xb7   :  { %541 = vmatmul.f32.vlgmr.msrb.gmra.mxu3 %v201_v46 }
  0xb8   :  { %887 = vmatmul.msk.f32.vlgmr.msrb.gmra.mxu1 %vm128_vm2, %v1029_v40  ;;  %324 = vmatmul.f32.gmra.mxu2 %v323_v6 }
  0xb9   :  { %260 = vmatmul.f32.gmra.mxu0 %v259_v5 }
  0xbf   :  { %547 = vmatmul.f32.gmra.mxu3 %v209_v52 }
  0xc0   :  { %888 = vmatmul.msk.f32.gmra.mxu1 %vm128_vm2, %v1019_v34  ;;  %441 = vmatmul.f32.vlgmr.msrb.gmra.mxu2 %v1043_v45 }
  0xc1   :  { %871 = vmatmul.msk.f32.vlgmr.msrb.gmra.mxu0 %vm128_vm2, %v1029_v40 }
  0xc7   :  { %553 = vmatmul.f32.gmra.mxu3 %v217_v15 }
  0xc8   :  { %889 = vmatmul.msk.f32.gmra.mxu1 %vm128_vm2, %v1093_v7  ;;  %446 = vmatmul.f32.gmra.mxu2 %v1039_v43 }
  0xc9   :  { %872 = vmatmul.msk.f32.gmra.mxu0 %vm128_vm2, %v1019_v34 }
  0xcf   :  { %559 = vmatmul.f32.gmra.mxu3 %v225_v26 }
  0xd0   :  { %890 = vmatmul.msk.f32.gmra.mxu1 %vm128_vm2, %v1084_v1  ;;  %451 = vmatmul.f32.gmra.mxu2 %v1104_v12 }
  0xd1   :  { %873 = vmatmul.msk.f32.gmra.mxu0 %vm128_vm2, %v1093_v7 }
  0xd7   :  { %565 = vmatmul.f32.gmra.mxu3 %v233_v49 }
  0xd8   :  { %891 = vmatmul.msk.f32.gmra.mxu1 %vm128_vm2, %v1124_v23  ;;  %456 = vmatmul.f32.gmra.mxu2 %v1109_v14 }
  0xd9   :  { %874 = vmatmul.msk.f32.gmra.mxu0 %vm128_vm2, %v1084_v1 }
  0xdf   :  { %571 = vmatmul.f32.gmra.mxu3 %v241_v8 }
  0xe0   :  { %892 = vmatmul.msk.f32.gmra.mxu1 %vm128_vm2, %v1151_v42  ;;  %461 = vmatmul.f32.gmra.mxu2 %v1141_v31 }
  0xe1   :  { %875 = vmatmul.msk.f32.gmra.mxu0 %vm128_vm2, %v1124_v23 }
  0xe7   :  { %577 = vmatmul.f32.gmra.mxu3 %v249_v29 }
  0xe8   :  { %893 = vmatmul.msk.f32.gmra.mxu1 %vm128_vm2, %v1179_v2  ;;  %466 = vmatmul.f32.gmra.mxu2 %v1167_v57 }
  0xe9   :  { %876 = vmatmul.msk.f32.gmra.mxu0 %vm128_vm2, %v1151_v42 }
  0xef   :  { %583 = vmatmul.f32.gmra.mxu3 %v257_v58 }
  0xf0   :  { %894 = vmatmul.msk.f32.gmra.mxu1 %vm128_vm2, %v1203_v25  ;;  %471 = vmatmul.f32.gmra.mxu2 %v248_v19 }
  0xf1   :  { %877 = vmatmul.msk.f32.gmra.mxu0 %vm128_vm2, %v1179_v2 }
  0xf5   :  { %v1273_v34 = vpop.f32.mrf.mxu1 }
  0xf7   :  { %589 = vmatmul.f32.gmra.mxu3 %v265_v47 }
  0xf8   :  { %895 = vmatmul.msk.f32.gmra.mxu1 %vm128_vm2, %v1026_v39  ;;  %476 = vmatmul.f32.gmra.mxu2 %v256_v38 }
  0xf9   :  { %878 = vmatmul.msk.f32.gmra.mxu0 %vm128_vm2, %v1203_v25 }
  0xfa   :  { %v388_v40 = vpop.f32.mrf.mxu3 }
  0xfd   :  { %v1281_v43 = vpop.f32.mrf.mxu1 }
  0xfe   :  { %v1283_v45 = vpop.f32.mrf.mxu0 }
  0xff   :  { %595 = vmatmul.f32.gmra.mxu3 %v273_v63 }
 0x100   :  { %896 = vmatmul.msk.f32.gmra.mxu1 %vm128_vm2, %v1057_v53  ;;  %481 = vmatmul.f32.gmra.mxu2 %v1041_v44 }
 0x101   :  { %879 = vmatmul.msk.f32.gmra.mxu0 %vm128_vm2, %v1026_v39 }
 0x102   :  { %v392_v46 = vpop.f32.mrf.mxu3 }
 0x103   :  { %v269_v47 = vpop.f32.mrf.mxu2 }
 0x104   :  { %v1292_v52 = vadd.f32 %v388_v40, %v269_v47 }
 0x105   :  { %v1294_v1 = vpop.f32.mrf.mxu1 }
 0x106   :  { %v1296_v7 = vpop.f32.mrf.mxu0 }
 0x107   :  { %601 = vmatmul.f32.gmra.mxu3 %v281_v9 }
 0x108   :  { %897 = vmatmul.msk.f32.gmra.mxu1 %vm128_vm2, %v1060_v54  ;;  %486 = vmatmul.f32.gmra.mxu2 %v1071_v60 }
 0x109   :  { %880 = vmatmul.msk.f32.gmra.mxu0 %vm128_vm2, %v1057_v53 }
 0x10a   :  { %v396_v39 = vpop.f32.mrf.mxu3 }
 0x10b   :  { %v277_v44 = vpop.f32.mrf.mxu2 }
 0x10c   :  { %v1305_v63 = vadd.f32 %v392_v46, %v277_v44 }
 0x10d   :  { %v1307_v12 = vpop.f32.mrf.mxu1 }
 0x10e   :  { %v1309_v14 = vpop.f32.mrf.mxu0 }
 0x10f   :  { %607 = vmatmul.f32.gmra.mxu3 %v289_v22  ;;  %v365_v4 = vadd.f32 %v1294_v1, %v1309_v14 }
 0x110   :  { %898 = vmatmul.msk.f32.gmra.mxu1 %vm128_vm2, %v1081_v0  ;;  %491 = vmatmul.f32.gmra.mxu2 %v1077_v62 }
 0x111   :  { %881 = vmatmul.msk.f32.gmra.mxu0 %vm128_vm2, %v1060_v54 }
 0x112   :  { %v400_v53 = vpop.f32.mrf.mxu3 }
 0x113   :  { %v285_v60 = vpop.f32.mrf.mxu2 }
 0x114   :  { %v1318_v9 = vadd.f32 %v396_v39, %v285_v60 }
 0x115   :  { %v1320_v15 = vpop.f32.mrf.mxu1 }
 0x116   :  { %v1322_v23 = vpop.f32.mrf.mxu0 }
 0x117   :  { %613 = vmatmul.f32.gmra.mxu3 %v297_v50 }
 0x118   :  { %899 = vmatmul.msk.f32.gmra.mxu1 %vm128_vm2, %v1116_v18  ;;  %496 = vmatmul.f32.gmra.mxu2 %v1106_v13 }
 0x119   :  { %882 = vmatmul.msk.f32.gmra.mxu0 %vm128_vm2, %v1081_v0 }
 0x11a   :  { %v404_v54 = vpop.f32.mrf.mxu3 }
 0x11b   :  { %v293_v62 = vpop.f32.mrf.mxu2 }
 0x11c   :  { %v1331_v22 = vadd.f32 %v400_v53, %v293_v62 }
 0x11d   :  { %v1333_v26 = vpop.f32.mrf.mxu1 }
 0x11e   :  { %v1335_v31 = vpop.f32.mrf.mxu0 }
 0x11f   :  { %619 = vmatmul.f32.gmra.mxu3 %v305_v10 }
 0x120   :  { %900 = vmatmul.msk.f32.gmra.mxu1 %vm128_vm2, %v1147_v36  ;;  %501 = vmatmul.f32.gmra.mxu2 %v1139_v30 }
 0x121   :  { %883 = vmatmul.msk.f32.gmra.mxu0 %vm128_vm2, %v1116_v18 }
 0x122   :  { %v408_v0 = vpop.f32.mrf.mxu3 }
 0x123   :  { %v301_v13 = vpop.f32.mrf.mxu2 }
 0x124   :  { %v1344_v42 = vadd.f32 %v404_v54, %v301_v13 }
 0x125   :  { %v1346_v49 = vpop.f32.mrf.mxu1 }
 0x126   :  { %v1348_v50 = vpop.f32.mrf.mxu0 }
 0x127   :  { %625 = vmatmul.f32.gmra.mxu3 %v313_v32 }
 0x128   :  { %901 = vmatmul.msk.f32.gmra.mxu1 %vm128_vm2, %v1176_v61  ;;  %506 = vmatmul.f32.gmra.mxu2 %v1165_v56 }
 0x129   :  { %884 = vmatmul.msk.f32.gmra.mxu0 %vm128_vm2, %v1147_v36 }
 0x12a   :  { %v412_v18 = vpop.f32.mrf.mxu3 }
 0x12b   :  { %v309_v30 = vpop.f32.mrf.mxu2 }
 0x12c   :  { %v1357_v57 = vadd.f32 %v408_v0, %v309_v30  ;;  %v373_v0 = vadd.f32 %v1320_v15, %v1335_v31 }
 0x12d   :  { %v1359_v2 = vpop.f32.mrf.mxu1 }
 0x12e   :  { %v1361_v8 = vpop.f32.mrf.mxu0 }
 0x12f   :  { %631 = vmatmul.f32.gmra.mxu3 %v321_v59 }
 0x130   :  { %902 = vmatmul.msk.f32.gmra.mxu1 %vm128_vm2, %v1200_v24  ;;  %511 = vmatmul.f32.gmra.mxu2 %v1193_v17 }
 0x131   :  { %885 = vmatmul.msk.f32.gmra.mxu0 %vm128_vm2, %v1176_v61  ;;  %v357_v61 = vadd.f32 %v1273_v34, %v1283_v45 }
 0x132   :  { %v416_v36 = vpop.f32.mrf.mxu3 }
 0x133   :  { %v317_v56 = vpop.f32.mrf.mxu2 }
 0x134   :  { %v1370_v10 = vadd.f32 %v412_v18, %v317_v56 }
 0x135   :  { %v742_v11 = vpop.f32.mrf.mxu1 }
 0x136   :  { %v1372_v16 = vpop.f32.mrf.mxu0 }
 0x138   :  { %516 = vmatmul.f32.gmra.mxu2 %v1214_v33  ;;  %v361_v33 = vadd.f32 %v1281_v43, %v1296_v7  ;;  %v369_v7 = vadd.f32 %v1307_v12, %v1322_v23 }
 0x139   :  { %886 = vmatmul.msk.f32.gmra.mxu0 %vm128_vm2, %v1200_v24 }
 0x13a   :  { %v542_v19 = vpop.f32.mrf.mxu3 }
 0x13b   :  { %v325_v20 = vpop.f32.mrf.mxu2 }
 0x13c   :  { %v1377_v21 = vadd.f32 %v416_v36, %v325_v20 }
 0x13d   :  { %v746_v17 = vpop.f32.mrf.mxu1 }
 0x13e   :  { %v659_v25 = vpop.f32.mrf.mxu0 }
 0x142   :  { %v548_v27 = vpop.f32.mrf.mxu3 }
 0x143   :  { %v442_v28 = vpop.f32.mrf.mxu2 }
 0x144   :  { %v443_v29 = vadd.f32 %v442_v28, %v357_v61 }
 0x145   :  { %v750_v32 = vpop.f32.mrf.mxu1 }
 0x146   :  { %v663_v35 = vpop.f32.mrf.mxu0  ;;  %v543_v37 = vadd.f32 %v542_v19, %v443_v29  ;;  %v377_v19 = vadd.f32 %v1333_v26, %v1348_v50  ;;  %v381_v29 = vadd.f32 %v1346_v49, %v1361_v8  ;;  %v385_v50 = vadd.f32 %v1359_v2, %v1372_v16 }
 0x148   :  { %v660_v38 = vadd.f32 %v659_v25, %v543_v37 }
 0x14a   :  { %v743_v24 = vadd.f32 %v742_v11, %v660_v38  ;;  %v554_v41 = vpop.f32.mrf.mxu3 }
 0x14b   :  { %v447_v48 = vpop.f32.mrf.mxu2 }
 0x14c   :  { %805 = vst [vmem:[#allocation2] sm:$0xff] %v743_v24  ;;  %v448_v51 = vadd.f32 %v447_v48, %v361_v33 }
 0x14d   :  { %v754_v55 = vpop.f32.mrf.mxu1 }
 0x14e   :  { %v667_v58 = vpop.f32.mrf.mxu0  ;;  %v549_v59 = vadd.f32 %v548_v27, %v448_v51 }
 0x150   :  { %v664_v3 = vadd.f32 %v663_v35, %v549_v59 }
 0x152   :  { %v747_v5 = vadd.f32 %v746_v17, %v664_v3  ;;  %v560_v6 = vpop.f32.mrf.mxu3 }
 0x153   :  { %v452_v34 = vpop.f32.mrf.mxu2 }
 0x154   :  { %806 = vst [vmem:[#allocation2 + $0x8] sm:$0xff] %v747_v5  ;;  %v453_v40 = vadd.f32 %v452_v34, %v365_v4 }
 0x155   :  { %v758_v45 = vpop.f32.mrf.mxu1 }
 0x156   :  { %v671_v46 = vpop.f32.mrf.mxu0  ;;  %v555_v43 = vadd.f32 %v554_v41, %v453_v40 }
 0x158   :  { %v668_v47 = vadd.f32 %v667_v58, %v555_v43 }
 0x15a   :  { %v751_v39 = vadd.f32 %v750_v32, %v668_v47  ;;  %v566_v44 = vpop.f32.mrf.mxu3 }
 0x15b   :  { %v457_v53 = vpop.f32.mrf.mxu2 }
 0x15c   :  { %807 = vst [vmem:[#allocation2 + $0x10] sm:$0xff] %v751_v39  ;;  %v458_v60 = vadd.f32 %v457_v53, %v369_v7 }
 0x15d   :  { %v762_v54 = vpop.f32.mrf.mxu1 }
 0x15e   :  { %v675_v62 = vpop.f32.mrf.mxu0  ;;  %v561_v1 = vadd.f32 %v560_v6, %v458_v60 }
 0x160   :  { %v672_v14 = vadd.f32 %v671_v46, %v561_v1 }
 0x162   :  { %v755_v13 = vadd.f32 %v754_v55, %v672_v14  ;;  %v572_v18 = vpop.f32.mrf.mxu3 }
 0x163   :  { %v462_v30 = vpop.f32.mrf.mxu2 }
 0x164   :  { %808 = vst [vmem:[#allocation2 + $0x18] sm:$0xff] %v755_v13  ;;  %v463_v36 = vadd.f32 %v462_v30, %v373_v0 }
 0x165   :  { %v766_v12 = vpop.f32.mrf.mxu1 }
 0x166   :  { %v679_v56 = vpop.f32.mrf.mxu0  ;;  %v567_v11 = vadd.f32 %v566_v44, %v463_v36 }
 0x168   :  { %v676_v23 = vadd.f32 %v675_v62, %v567_v11 }
 0x16a   :  { %v759_v20 = vadd.f32 %v758_v45, %v676_v23  ;;  %v578_v17 = vpop.f32.mrf.mxu3 }
 0x16b   :  { %v467_v25 = vpop.f32.mrf.mxu2 }
 0x16c   :  { %809 = vst [vmem:[#allocation2 + $0x20] sm:$0xff] %v759_v20  ;;  %v468_v61 = vadd.f32 %v467_v25, %v377_v19 }
 0x16d   :  { %v770_v31 = vpop.f32.mrf.mxu1 }
 0x16e   :  { %v683_v27 = vpop.f32.mrf.mxu0  ;;  %v573_v28 = vadd.f32 %v572_v18, %v468_v61 }
 0x170   :  { %v680_v15 = vadd.f32 %v679_v56, %v573_v28 }
 0x172   :  { %v763_v32 = vadd.f32 %v762_v54, %v680_v15  ;;  %v584_v35 = vpop.f32.mrf.mxu3 }
 0x173   :  { %v472_v37 = vpop.f32.mrf.mxu2 }
 0x174   :  { %810 = vst [vmem:[#allocation2 + $0x28] sm:$0xff] %v763_v32  ;;  %v473_v38 = vadd.f32 %v472_v37, %v381_v29 }
 0x175   :  { %v774_v51 = vpop.f32.mrf.mxu1 }
 0x176   :  { %v687_v33 = vpop.f32.mrf.mxu0  ;;  %v579_v24 = vadd.f32 %v578_v17, %v473_v38 }
 0x178   :  { %v684_v26 = vadd.f32 %v683_v27, %v579_v24 }
 0x17a   :  { %v767_v41 = vadd.f32 %v766_v12, %v684_v26  ;;  %v590_v48 = vpop.f32.mrf.mxu3 }
 0x17b   :  { %v477_v55 = vpop.f32.mrf.mxu2 }
 0x17c   :  { %811 = vst [vmem:[#allocation2 + $0x30] sm:$0xff] %v767_v41  ;;  %v478_v58 = vadd.f32 %v477_v55, %v385_v50 }
 0x17d   :  { %v778_v34 = vpop.f32.mrf.mxu1 }
 0x17e   :  { %v691_v59 = vpop.f32.mrf.mxu0  ;;  %v585_v3 = vadd.f32 %v584_v35, %v478_v58 }
 0x180   :  { %v688_v49 = vadd.f32 %v687_v33, %v585_v3 }
 0x182   :  { %v771_v8 = vadd.f32 %v770_v31, %v688_v49  ;;  %v596_v4 = vpop.f32.mrf.mxu3 }
 0x183   :  { %v482_v5 = vpop.f32.mrf.mxu2 }
 0x184   :  { %812 = vst [vmem:[#allocation2 + $0x38] sm:$0xff] %v771_v8  ;;  %v483_v6 = vadd.f32 %v482_v5, %v1292_v52 }
 0x185   :  { %v782_v44 = vpop.f32.mrf.mxu1 }
 0x186   :  { %v695_v40 = vpop.f32.mrf.mxu0  ;;  %v591_v45 = vadd.f32 %v590_v48, %v483_v6 }
 0x188   :  { %v692_v46 = vadd.f32 %v691_v59, %v591_v45 }
 0x18a   :  { %v775_v2 = vadd.f32 %v774_v51, %v692_v46  ;;  %v602_v16 = vpop.f32.mrf.mxu3 }
 0x18b   :  { %v487_v43 = vpop.f32.mrf.mxu2 }
 0x18c   :  { %813 = vst [vmem:[#allocation2 + $0x40] sm:$0xff] %v775_v2  ;;  %v488_v47 = vadd.f32 %v487_v43, %v1305_v63 }
 0x18d   :  { %v786_v13 = vpop.f32.mrf.mxu1 }
 0x18e   :  { %v699_v7 = vpop.f32.mrf.mxu0  ;;  %v597_v39 = vadd.f32 %v596_v4, %v488_v47 }
 0x190   :  { %v696_v53 = vadd.f32 %v695_v40, %v597_v39 }
 0x192   :  { %v779_v60 = vadd.f32 %v778_v34, %v696_v53  ;;  %v608_v52 = vpop.f32.mrf.mxu3 }
 0x193   :  { %v492_v54 = vpop.f32.mrf.mxu2 }
 0x194   :  { %814 = vst [vmem:[#allocation2 + $0x48] sm:$0xff] %v779_v60  ;;  %v493_v62 = vadd.f32 %v492_v54, %v1318_v9 }
 0x195   :  { %v790_v19 = vpop.f32.mrf.mxu1 }
 0x196   :  { %v603_v1 = vadd.f32 %v602_v16, %v493_v62  ;;  %v703_v14 = vpop.f32.mrf.mxu0 }
 0x198   :  { %v700_v0 = vadd.f32 %v699_v7, %v603_v1 }
 0x19a   :  { %v783_v18 = vadd.f32 %v782_v44, %v700_v0  ;;  %v614_v56 = vpop.f32.mrf.mxu3 }
 0x19b   :  { %v497_v30 = vpop.f32.mrf.mxu2 }
 0x19c   :  { %815 = vst [vmem:[#allocation2 + $0x50] sm:$0xff] %v783_v18  ;;  %v498_v36 = vadd.f32 %v497_v30, %v1331_v22 }
 0x19d   :  { %v794_v22 = vpop.f32.mrf.mxu1 }
 0x19e   :  { %v609_v63 = vadd.f32 %v608_v52, %v498_v36  ;;  %v707_v12 = vpop.f32.mrf.mxu0 }
 0x1a0   :  { %v704_v11 = vadd.f32 %v703_v14, %v609_v63 }
 0x1a2   :  { %v787_v23 = vadd.f32 %v786_v13, %v704_v11  ;;  %v620_v61 = vpop.f32.mrf.mxu3 }
 0x1a3   :  { %v502_v20 = vpop.f32.mrf.mxu2 }
 0x1a4   :  { %816 = vst [vmem:[#allocation2 + $0x58] sm:$0xff] %v787_v23  ;;  %v503_v9 = vadd.f32 %v502_v20, %v1344_v42 }
 0x1a5   :  { %v798_v26 = vpop.f32.mrf.mxu1 }
 0x1a6   :  { %v615_v17 = vadd.f32 %v614_v56, %v503_v9  ;;  %v711_v28 = vpop.f32.mrf.mxu0 }
 0x1a8   :  { %v708_v25 = vadd.f32 %v707_v12, %v615_v17 }
 0x1aa   :  { %v791_v27 = vadd.f32 %v790_v19, %v708_v25  ;;  %v626_v37 = vpop.f32.mrf.mxu3 }
 0x1ab   :  { %v507_v15 = vpop.f32.mrf.mxu2 }
 0x1ac   :  { %817 = vst [vmem:[#allocation2 + $0x60] sm:$0xff] %v791_v27  ;;  %v508_v31 = vadd.f32 %v507_v15, %v1357_v57 }
 0x1ae   :  { %v621_v29 = vadd.f32 %v620_v61, %v508_v31  ;;  %v715_v24 = vpop.f32.mrf.mxu0 }
 0x1b0   :  { %v712_v32 = vadd.f32 %v711_v28, %v621_v29 }
 0x1b2   :  { %v795_v35 = vadd.f32 %v794_v22, %v712_v32  ;;  %v632_v55 = vpop.f32.mrf.mxu3 }
 0x1b3   :  { %v512_v38 = vpop.f32.mrf.mxu2 }
 0x1b4   :  { %818 = vst [vmem:[#allocation2 + $0x68] sm:$0xff] %v795_v35  ;;  %v513_v33 = vadd.f32 %v512_v38, %v1370_v10  ;;  %v802_v10 = vpop.f32.mrf.mxu1 }
 0x1b6   :  { %v627_v42 = vadd.f32 %v626_v37, %v513_v33  ;;  %v719_v58 = vpop.f32.mrf.mxu0 }
 0x1b8   :  { %v716_v50 = vadd.f32 %v715_v24, %v627_v42 }
 0x1ba   :  { %v799_v41 = vadd.f32 %v798_v26, %v716_v50 }
 0x1bb   :  { %v517_v48 = vpop.f32.mrf.mxu2 }
 0x1bc   :  { %819 = vst [vmem:[#allocation2 + $0x70] sm:$0xff] %v799_v41  ;;  %v518_v51 = vadd.f32 %v517_v48, %v1377_v21 }
 0x1be   :  { %v633_v57 = vadd.f32 %v632_v55, %v518_v51 }
 0x1c0   :  { %v720_v59 = vadd.f32 %v719_v58, %v633_v57 }
 0x1c2   :  { %v803_v3 = vadd.f32 %v802_v10, %v720_v59 }
 0x1c4   :  { %820 = vst [vmem:[#allocation2 + $0x78] sm:$0xff] %v803_v3 }
 0x1c5   :  { %833 = dma.vmem_to_hbm [thread:$0]  %s826_s1, 2048, %s828_s19, [#allocation3], %s944_s20, %s944_s20, %s945_s21  }
 0x1c6   :  { %939 = dma.done.wait [#allocation3], 2048  }
 0x1c7   :  { %940 = vsyncadd [#allocation3], 4294965248 }
 0x1c8   :  { %838 = vsyncpa [#allocation3], 1 }

</bundles_post_ra>
